<compile_context>
chip_gen: v5e
topology: v5e:2x2
jax: 0.10.0
libtpu: 0.0.40
codegen_flags: <defaults>
</compile_context>

<pallas_src>
import functools

import jax
import jax.numpy as jnp
from jax.experimental import pallas as pl
from jax.experimental.pallas import tpu as pltpu


# ---------------------------------------------------------------------------
# helpers
# ---------------------------------------------------------------------------
def _pick_tile(dim, target, align):
    """Largest tile <= target that is align-aligned and divides dim (else the full dim)."""
    if dim <= target:
        return dim
    t = (target // align) * align
    while t >= align:
        if dim % t == 0:
            return t
        t -= align
    return dim


def _cparams(n_parallel_axes, vmem_mb=None):
    kw = dict(dimension_semantics=("parallel",) * n_parallel_axes)
    if vmem_mb is not None:
        kw["vmem_limit_bytes"] = vmem_mb * 1024 * 1024
    return pltpu.CompilerParams(**kw)


def _layernorm(x, g, b, eps=1e-5):
    mu = jnp.mean(x, axis=-1, keepdims=True)
    var = jnp.mean(jnp.square(x - mu), axis=-1, keepdims=True)  # biased, like torch LN
    return (x - mu) * jax.lax.rsqrt(var + eps) * g + b


# ---------------------------------------------------------------------------
# fused (optional LN) -> matmul -> +bias
# ---------------------------------------------------------------------------
def _matmul_kernel(*refs, use_ln):
    i = 0
    x_ref = refs[i]; i += 1
    if use_ln:
        g_ref, bln_ref = refs[i], refs[i + 1]; i += 2
    w_ref, b_ref = refs[i], refs[i + 1]
    o_ref = refs[-1]

    x = x_ref[...]
    if use_ln:
        x = _layernorm(x, g_ref[...], bln_ref[...])
    o_ref[...] = jnp.dot(x.astype(jnp.bfloat16), w_ref[...],
                         preferred_element_type=jnp.float32) + b_ref[...]


def pallas_matmul(x, w, b, *, ln=None, tm_target=256, tn_target=512):
    """out = LN?(x) @ w + b ; bf16 MXU inputs, f32 accumulation, tiled over (M, N)."""
    M, K = x.shape
    N = w.shape[1]
    tm = _pick_tile(M, tm_target, 8)
    tn = _pick_tile(N, tn_target, 128)
    grid = (M // tm, N // tn)

    inputs = [x]
    in_specs = [pl.BlockSpec((tm, K), lambda i, j: (i, 0))]
    if ln is not None:
        g, bl = ln
        inputs += [g.reshape(1, K), bl.reshape(1, K)]
        in_specs += [pl.BlockSpec((1, K), lambda i, j: (0, 0)),
                     pl.BlockSpec((1, K), lambda i, j: (0, 0))]
    inputs += [w, b.reshape(1, N)]
    in_specs += [pl.BlockSpec((K, tn), lambda i, j: (0, j)),
                 pl.BlockSpec((1, tn), lambda i, j: (0, j))]

    kern = functools.partial(_matmul_kernel, use_ln=ln is not None)
    return pl.pallas_call(
        kern,
        grid=grid,
        in_specs=in_specs,
        out_specs=pl.BlockSpec((tm, tn), lambda i, j: (i, j)),
        out_shape=jax.ShapeDtypeStruct((M, N), jnp.float32),
        compiler_params=_cparams(2),
    )(*inputs)


# ---------------------------------------------------------------------------
# fused half-FFN:  out = x + 0.5 * ( swish( LN(x) @ W1 + b1 ) @ W2 + b2 )
# ---------------------------------------------------------------------------
def _ffn_kernel(x_ref, g_ref, bl_ref, w1_ref, b1_ref, w2_ref, b2_ref, o_ref):
    x = x_ref[...]
    xn = _layernorm(x, g_ref[...], bl_ref[...])
    h = jnp.dot(xn.astype(jnp.bfloat16), w1_ref[...],
                preferred_element_type=jnp.float32) + b1_ref[...]
    h = h * jax.nn.sigmoid(h)                       # Swish (f32 on VPU/EUP)
    y = jnp.dot(h.astype(jnp.bfloat16), w2_ref[...],
                preferred_element_type=jnp.float32) + b2_ref[...]
    o_ref[...] = x + 0.5 * y


def pallas_ffn(x, p):
    M, D = x.shape
    H = p["w1"].shape[1]
    tm = _pick_tile(M, 256, 8)
    return pl.pallas_call(
        _ffn_kernel,
        grid=(M // tm,),
        in_specs=[pl.BlockSpec((tm, D), lambda i: (i, 0)),
                  pl.BlockSpec((1, D), lambda i: (0, 0)),
                  pl.BlockSpec((1, D), lambda i: (0, 0)),
                  pl.BlockSpec((D, H), lambda i: (0, 0)),
                  pl.BlockSpec((1, H), lambda i: (0, 0)),
                  pl.BlockSpec((H, D), lambda i: (0, 0)),
                  pl.BlockSpec((1, D), lambda i: (0, 0))],
        out_specs=pl.BlockSpec((tm, D), lambda i: (i, 0)),
        out_shape=jax.ShapeDtypeStruct((M, D), jnp.float32),
        compiler_params=_cparams(1, vmem_mb=64),
    )(x, p["ln_g"].reshape(1, D), p["ln_b"].reshape(1, D),
      p["w1"], p["b1"].reshape(1, H), p["w2"], p["b2"].reshape(1, D))


# ---------------------------------------------------------------------------
# fused attention sub-block (one batch element per grid step, all 8 heads in-kernel):
#   out = x + ( rel-pos MHSA( LN(x) ) @ Wo + bo )
# ---------------------------------------------------------------------------
def _attn_block_kernel(x_ref, g_ref, bl_ref, wqkv_ref, ew_ref, bias_ref,
                       wo_ref, bo_ref, o_ref, *, heads, dh, scale):
    x = x_ref[0]                                      # (n, D) f32
    n = x.shape[0]
    inner = heads * dh
    xn = _layernorm(x, g_ref[...], bl_ref[...])
    # fused QKV projection (to_q / to_kv have no bias in the reference module)
    qkv = jnp.dot(xn.astype(jnp.bfloat16), wqkv_ref[...],
                  preferred_element_type=jnp.float32)          # (n, 3*inner)
    ew = ew_ref[...]                                   # (dh, R_pad) bf16 reversed rel window
    bias = bias_ref[0]                                 # (1, n) additive key pad-mask (0 / -1e9)
    outs = []
    for h in range(heads):                             # static, fully unrolled (heads = 8)
        q = (qkv[:, h * dh:(h + 1) * dh] * scale).astype(jnp.bfloat16)
        k = qkv[:, inner + h * dh:inner + (h + 1) * dh].astype(jnp.bfloat16)
        v = qkv[:, 2 * inner + h * dh:2 * inner + (h + 1) * dh].astype(jnp.bfloat16)
        # content scores q @ k^T (MXU, contraction on dh)
        dots = jax.lax.dot_general(q, k, (((1,), (1,)), ((), ())),
                                   preferred_element_type=jnp.float32)
        # positional scores against the reversed rel-pos window, then the relative-shift
        # alignment: row i is rotated right by i (strided pltpu.roll), so
        # pos[i, j] = q_i . E[clip(i-j)] lands at column j + n - 1.
        rel = jnp.dot(q, ew, preferred_element_type=jnp.float32)          # (n, R_pad)
        rel = pltpu.roll(rel, 0, 1, stride=1, stride_axis=0)
        logits = dots + rel[:, n - 1:2 * n - 1] + bias
        m = jnp.max(logits, axis=-1, keepdims=True)
        p = jnp.exp(logits - m)
        l = jnp.sum(p, axis=-1, keepdims=True)
        attn = p * pl.reciprocal(l, approx=True)       # EUP reciprocal (free slot)
        outs.append(jnp.dot(attn.astype(jnp.bfloat16), v,
                            preferred_element_type=jnp.float32))
    heads_cat = jnp.concatenate(outs, axis=-1).astype(jnp.bfloat16)       # (n, inner)
    y = jnp.dot(heads_cat, wo_ref[...], preferred_element_type=jnp.float32) + bo_ref[...]
    o_ref[0] = x + y                                   # one lane-dense store


def pallas_attn_block(x, a, ew_t, mask_bias, *, heads, dh):
    B, n, D = x.shape
    inner = heads * dh
    dh_, r_pad = ew_t.shape
    kern = functools.partial(_attn_block_kernel, heads=heads, dh=dh, scale=dh ** -0.5)
    return pl.pallas_call(
        kern,
        grid=(B,),
        in_specs=[pl.BlockSpec((1, n, D), lambda b: (b, 0, 0)),
                  pl.BlockSpec((1, D), lambda b: (0, 0)),
                  pl.BlockSpec((1, D), lambda b: (0, 0)),
                  pl.BlockSpec((D, 3 * inner), lambda b: (0, 0)),
                  pl.BlockSpec((dh_, r_pad), lambda b: (0, 0)),
                  pl.BlockSpec((1, 1, n), lambda b: (b, 0, 0)),
                  pl.BlockSpec((inner, D), lambda b: (0, 0)),
                  pl.BlockSpec((1, D), lambda b: (0, 0))],
        out_specs=pl.BlockSpec((1, n, D), lambda b: (b, 0, 0)),
        out_shape=jax.ShapeDtypeStruct((B, n, D), jnp.float32),
        compiler_params=_cparams(1, vmem_mb=64),
    )(x, a["ln_g"].reshape(1, D), a["ln_b"].reshape(1, D), a["wqkv"], ew_t,
      mask_bias, a["wo"], a["bo"].reshape(1, D))


def _rel_pos_window(rel_emb, n, max_pos):
    """(dh, R_pad) bf16: reversed window of the rel-pos table, padded to 128 lanes."""
    r = 2 * n - 1
    offs = (n - 1) - jnp.arange(r)                    # i - j, from +(n-1) down to -(n-1)
    idx = jnp.clip(offs, -max_pos, max_pos) + max_pos
    ew = rel_emb[idx]                                 # (r, dh) small XLA gather (glue)
    r_pad = ((r + 127) // 128) * 128
    ew = jnp.pad(ew, ((0, r_pad - r), (0, 0)))
    return jnp.transpose(ew).astype(jnp.bfloat16)     # (dh, r_pad)


# ---------------------------------------------------------------------------
# fused conv module (one batch element per grid step):
#   out = x + PW2( Swish( BN( DWConv31( GLU( LN(x) @ [Wa|Wb] ) ) ) ) )
#   ("same" padding done in-kernel via masked pltpu.roll taps; BN(eval) folded into taps)
# ---------------------------------------------------------------------------
def _conv_module_kernel(x_ref, g_ref, bl_ref, wa_ref, ba_ref, wb_ref, bb_ref,
                        dww_ref, dwb_ref, w2_ref, b2_ref, o_ref, *, ksize, pad_l):
    x = x_ref[0]                                      # (n, D) f32
    n = x.shape[0]
    xn = _layernorm(x, g_ref[...], bl_ref[...]).astype(jnp.bfloat16)
    a = jnp.dot(xn, wa_ref[...], preferred_element_type=jnp.float32) + ba_ref[...]
    c = jnp.dot(xn, wb_ref[...], preferred_element_type=jnp.float32) + bb_ref[...]
    y = a * jax.nn.sigmoid(c)                         # GLU, (n, C) f32
    row = jax.lax.broadcasted_iota(jnp.int32, y.shape, 0)
    acc = jnp.zeros(y.shape, jnp.float32)
    for kk in range(ksize):                           # static unrolled taps
        d = kk - pad_l                                # out[t] += w[kk] * y[t + d]
        shifted = pltpu.roll(y, (-d) % n, axis=0)     # XLU sublane rotate
        if d < 0:                                     # one-sided validity masks (static)
            shifted = jnp.where(row >= -d, shifted, 0.0)
        elif d > 0:
            shifted = jnp.where(row < n - d, shifted, 0.0)
        acc = acc + shifted * dww_ref[kk:kk + 1, :]
    acc = acc + dwb_ref[...]                          # conv bias + BatchNorm(eval), pre-folded
    z = acc * jax.nn.sigmoid(acc)                     # Swish
    out = jnp.dot(z.astype(jnp.bfloat16), w2_ref[...],
                  preferred_element_type=jnp.float32) + b2_ref[...]
    o_ref[0] = x + out


def pallas_conv_module(x, c):
    B, n, D = x.shape
    C = c["wa"].shape[1]
    K = c["dw_w"].shape[0]
    # fold BatchNorm1d (eval) affine into the depthwise-conv taps / bias (wrapper-side, tiny)
    bn_scale = c["bn_g"] * jax.lax.rsqrt(c["bn_rv"] + 1e-5)
    bn_shift = c["bn_b"] - c["bn_rm"] * bn_scale
    dw_w = c["dw_w"] * bn_scale[None, :]
    dw_b = c["dw_b"] * bn_scale + bn_shift
    kern = functools.partial(_conv_module_kernel, ksize=K, pad_l=K // 2)
    return pl.pallas_call(
        kern,
        grid=(B,),
        in_specs=[pl.BlockSpec((1, n, D), lambda b: (b, 0, 0)),
                  pl.BlockSpec((1, D), lambda b: (0, 0)),
                  pl.BlockSpec((1, D), lambda b: (0, 0)),
                  pl.BlockSpec((D, C), lambda b: (0, 0)),
                  pl.BlockSpec((1, C), lambda b: (0, 0)),
                  pl.BlockSpec((D, C), lambda b: (0, 0)),
                  pl.BlockSpec((1, C), lambda b: (0, 0)),
                  pl.BlockSpec((K, C), lambda b: (0, 0)),
                  pl.BlockSpec((1, C), lambda b: (0, 0)),
                  pl.BlockSpec((C, D), lambda b: (0, 0)),
                  pl.BlockSpec((1, D), lambda b: (0, 0))],
        out_specs=pl.BlockSpec((1, n, D), lambda b: (b, 0, 0)),
        out_shape=jax.ShapeDtypeStruct((B, n, D), jnp.float32),
        compiler_params=_cparams(1, vmem_mb=64),
    )(x, c["ln_g"].reshape(1, D), c["ln_b"].reshape(1, D),
      c["wa"], c["ba"].reshape(1, C), c["wb"], c["bb"].reshape(1, C),
      dw_w, dw_b.reshape(1, C), c["pw2_w"], c["pw2_b"].reshape(1, D))


# ---------------------------------------------------------------------------
# ConformerBlock + ConformerLinear head
# ---------------------------------------------------------------------------
def conformer_linear_head(feat, mask_bias, p, cfg):
    B, n, D = feat.shape
    heads, dh = 8, cfg["last_dim_head"]               # ConformerLinear hardcodes heads=8
    pb = p["block"]

    # x = 0.5 * FF1(LN(x)) + x   (single fused kernel)
    x2d = pallas_ffn(feat.reshape(B * n, D), pb["ff1"])
    x3d = x2d.reshape(B, n, D)

    # x = Attn(LN(x)) + x   (single fused kernel per batch element)
    # NOTE: original ConformerLinear passes mask=None; the additive key pad-mask here
    # only suppresses padded frames (pass zeros in mask_bias to match bit-exactly).
    a = pb["attn"]
    ew_t = _rel_pos_window(a["rel_emb"], n, cfg.get("max_pos_emb", 512))
    x3d = pallas_attn_block(x3d, a, ew_t, mask_bias, heads=heads, dh=dh)

    # x = Conv(x) + x   (single fused kernel per batch element)
    x3d = pallas_conv_module(x3d, pb["conv"])

    # x = 0.5 * FF2(LN(x)) + x
    x2d = pallas_ffn(x3d.reshape(B * n, D), pb["ff2"])

    # post-LN fused into the final vocab projection (output padded to a 128-lane multiple);
    # Dropout(p=0) is identity.
    out_pad = pallas_matmul(x2d, p["lin_w_pad"], p["lin_b_pad"],
                            ln=(pb["post_g"], pb["post_b"]))
    v1 = p["vocab_p1"]
    return out_pad[:, :v1].reshape(B, n, v1)


# ---------------------------------------------------------------------------
# ConformerMutiModel forward
# ---------------------------------------------------------------------------
def conformer_muti_model_forward(batch, params, cfg, lang=None):
    B = len(batch)
    lengths = [b.shape[0] for b in batch]
    T = max(lengths)
    n_mels = batch[0].shape[1]

    # pad_sequence(batch, batch_first=True) + validity mask (1 = real frame)
    feature = jnp.stack([jnp.pad(b, ((0, T - b.shape[0]), (0, 0))) for b in batch])
    valid = jnp.stack([(jnp.arange(T) < l) for l in lengths]).astype(jnp.float32)

    # TODO(synk): ConformerModel featurizer definition not provided; stand-in =
    # zero padded frames, subsample time by `sub_sampling`, Linear(n_mels -> linear_dim).
    feat = feature * valid[:, :, None]
    feat = feat[:, ::cfg["sub_sampling"], :]
    Bf, Ts, _ = feat.shape
    feat2d = pallas_matmul(feat.reshape(Bf * Ts, n_mels),
                           params["feat_w"], params["feat_b"])
    feat = feat2d.reshape(Bf, Ts, cfg["linear_dim"])

    # per-utterance feature lengths (PyTorch uses these for the LSTM pack path);
    # here they additionally drive the attention key pad-mask (additive bias, precomputed).
    feat_len = jnp.floor(jnp.array([l / T * Ts for l in lengths])).astype(jnp.int32)
    key_mask = (jnp.arange(Ts)[None, :] < feat_len[:, None]).astype(jnp.float32)
    mask_bias = ((1.0 - key_mask) * (-1e9)).reshape(B, 1, Ts)

    res = {}
    keys = [lang] if lang is not None else list(cfg["lang2vocab"].keys())
    for key in keys:
        res[key] = conformer_linear_head(feat, mask_bias, params["last_projects"][key], cfg)
    return res


# ---------------------------------------------------------------------------
# deterministic synthetic parameter init (matmul weights stored bf16 for MXU inputs)
# ---------------------------------------------------------------------------
def init_params(key, cfg):
    counter = [0]
    bf = jnp.bfloat16

    def rand(shape, dtype=jnp.float32, scale=0.02):
        counter[0] += 1
        v = scale * jax.random.normal(jax.random.fold_in(key, counter[0]), shape, jnp.float32)
        return v.astype(dtype)

    D = cfg["linear_dim"]
    heads, dh = 8, cfg["last_dim_head"]
    inner_attn = heads * dh
    ffh = 4 * D
    conv_inner = 2 * D
    K = 31
    P = cfg.get("max_pos_emb", 512)

    def ff_params():
        return dict(ln_g=jnp.ones((D,), jnp.float32), ln_b=jnp.zeros((D,), jnp.float32),
                    w1=rand((D, ffh), bf), b1=rand((ffh,)),
                    w2=rand((ffh, D), bf), b2=rand((D,)))

    def attn_params():
        # NOTE: columns are [Wq | Wk | Wv]; PyTorch to_q / to_kv have no bias.
        return dict(ln_g=jnp.ones((D,), jnp.float32), ln_b=jnp.zeros((D,), jnp.float32),
                    wqkv=rand((D, 3 * inner_attn), bf),
                    wo=rand((inner_attn, D), bf), bo=rand((D,)),
                    rel_emb=rand((2 * P + 1, dh)))

    def conv_params():
        # NOTE: PyTorch Conv1d weights are (C_out, C_in, K); a real-checkpoint loader must
        # transpose pointwise convs to (C_in, C_out) and the depthwise conv to (K, C).
        return dict(ln_g=jnp.ones((D,), jnp.float32), ln_b=jnp.zeros((D,), jnp.float32),
                    wa=rand((D, conv_inner), bf), ba=rand((conv_inner,)),
                    wb=rand((D, conv_inner), bf), bb=rand((conv_inner,)),
                    dw_w=rand((K, conv_inner)), dw_b=rand((conv_inner,)),
                    bn_g=jnp.ones((conv_inner,), jnp.float32),
                    bn_b=jnp.zeros((conv_inner,), jnp.float32),
                    bn_rm=jnp.zeros((conv_inner,), jnp.float32),
                    bn_rv=jnp.ones((conv_inner,), jnp.float32),
                    pw2_w=rand((conv_inner, D), bf), pw2_b=rand((D,)))

    params = dict(feat_w=rand((cfg["n_mels"], D), bf), feat_b=rand((D,)), last_projects={})
    for lg, vocab in cfg["lang2vocab"].items():
        v1 = vocab + 1
        npad = ((v1 + 127) // 128) * 128
        lin_w = rand((D, v1))
        lin_b = rand((v1,))
        params["last_projects"][lg] = dict(
            block=dict(ff1=ff_params(), attn=attn_params(), conv=conv_params(),
                       ff2=ff_params(),
                       post_g=jnp.ones((D,), jnp.float32),
                       post_b=jnp.zeros((D,), jnp.float32)),
            lin_w_pad=jnp.pad(lin_w, ((0, 0), (0, npad - v1))).astype(bf),
            lin_b_pad=jnp.pad(lin_b, ((0, npad - v1),)),
            vocab_p1=v1,
        )
    return params


# ---------------------------------------------------------------------------
if __name__ == "__main__":
    cfg = dict(
        lang2vocab={"en": 10, "zh": 12},
        linear_dim=64,        # small stand-in for 768
        n_mels=16,            # small stand-in for 80
        last_dim_head=8,      # small stand-in for 32 (heads=8 hardcoded)
        sub_sampling=2,
        conformer_linear=True,
        max_pos_emb=512,
    )
    root = jax.random.PRNGKey(0)
    kp, kx0, kx1 = jax.random.split(root, 3)
    params = init_params(kp, cfg)

    # variable-length "batch" of mel features: (T_i, n_mels)
    batch = [
        jax.random.normal(kx0, (16, cfg["n_mels"]), jnp.float32),
        jax.random.normal(kx1, (12, cfg["n_mels"]), jnp.float32),
    ]

    res = conformer_muti_model_forward(batch, params, cfg, lang=None)
    for k in sorted(res):
        jax.block_until_ready(res[k])
        assert res[k].shape == (2, 8, cfg["lang2vocab"][k] + 1), res[k].shape
        assert bool(jnp.all(jnp.isfinite(res[k])))
    print("KERNEL_OK")
</pallas_src>

<mosaic_0001>
module attributes {stable_mosaic.version = 11 : i64} {
  func.func @_matmul_kernel(%arg0: i32, %arg1: i32, %arg2: memref<16x16xf32, #tpu.memory_space<vmem>>, %arg3: memref<16x64xbf16, #tpu.memory_space<vmem>>, %arg4: memref<1x64xf32, #tpu.memory_space<vmem>>, %arg5: memref<16x64xf32, #tpu.memory_space<vmem>>) attributes {dimension_semantics = [#tpu.dimension_semantics<parallel>, #tpu.dimension_semantics<parallel>], iteration_bounds = array<i64: 1, 1>, scalar_prefetch = 0 : i64, scratch_operands = 0 : i64, tpu.core_type = #tpu.core_type<tc>, window_params = [{transform_indices = @transform_0, window_bounds = array<i64: 16, 16>}, {transform_indices = @transform_1, window_bounds = array<i64: 16, 64>}, {transform_indices = @transform_2, window_bounds = array<i64: 1, 64>}, {transform_indices = @transform_3, window_bounds = array<i64: 16, 64>}]} {
    %c0 = arith.constant 0 : index
    %c0_0 = arith.constant 0 : index
    %0 = vector.load %arg2[%c0, %c0_0] : memref<16x16xf32, #tpu.memory_space<vmem>>, vector<16x16xf32>
    %1 = arith.truncf %0 : vector<16x16xf32> to vector<16x16xbf16>
    %c0_1 = arith.constant 0 : index
    %c0_2 = arith.constant 0 : index
    %2 = vector.load %arg3[%c0_1, %c0_2] : memref<16x64xbf16, #tpu.memory_space<vmem>>, vector<16x64xbf16>
    %cst = arith.constant dense<0.000000e+00> : vector<16x64xf32>
    %3 = tpu.matmul %1, %2, %cst {dimension_numbers = #tpu.dot_dimension_numbers<[1], [0], [0], [1], [0, 0, 1, 1], [], []>} : vector<16x16xbf16>, vector<16x64xbf16>, vector<16x64xf32> -> vector<16x64xf32>
    %c0_3 = arith.constant 0 : index
    %c0_4 = arith.constant 0 : index
    %4 = vector.load %arg4[%c0_3, %c0_4] : memref<1x64xf32, #tpu.memory_space<vmem>>, vector<1x64xf32>
    %5 = vector.broadcast %4 : vector<1x64xf32> to vector<16x64xf32>
    %6 = arith.addf %3, %5 : vector<16x64xf32>
    %c0_5 = arith.constant 0 : index
    %c0_6 = arith.constant 0 : index
    %7 = vector.load %arg5[%c0_5, %c0_6] : memref<16x64xf32, #tpu.memory_space<vmem>>, vector<16x64xf32>
    tpu.vector_store %arg5[%c0_5, %c0_6], %6 {strides = array<i32>} : memref<16x64xf32, #tpu.memory_space<vmem>>, vector<16x64xf32>,
    return
  }
  func.func @transform_0(%arg0: i32, %arg1: i32) -> (i32, i32) {
    %c0_i32 = arith.constant 0 : i32
    %c0_i32_0 = arith.constant 0 : i32
    return %arg0, %c0_i32 : i32, i32
  }
  func.func @transform_1(%arg0: i32, %arg1: i32) -> (i32, i32) {
    %c0_i32 = arith.constant 0 : i32
    %c0_i32_0 = arith.constant 0 : i32
    return %c0_i32, %arg1 : i32, i32
  }
  func.func @transform_2(%arg0: i32, %arg1: i32) -> (i32, i32) {
    %c0_i32 = arith.constant 0 : i32
    %c0_i32_0 = arith.constant 0 : i32
    return %c0_i32, %arg1 : i32, i32
  }
  func.func @transform_3(%arg0: i32, %arg1: i32) -> (i32, i32) {
    %c0_i32 = arith.constant 0 : i32
    return %arg0, %arg1 : i32, i32
  }
}

</mosaic_0001>

<bundles_post_ra>
// kernel: tpu_custom_call.1
= control target key start
LH: loop header
LB: loop body
LE: loop exit
PB: predicated region body
PF: predicated region fallthrough
CT: control target
= control target key end

     0   :  { %8 = vsyncpa [#allocation3], 0  ;;  %s241_s0 = inlined_call_operand.hbm [shape: f32[16,16], index: 0, kind: input, shape index: {}]   ;;  %s242_s1 = inlined_call_operand.hbm [shape: bf16[16,64], index: 1, kind: input, shape index: {}]   ;;  %s243_s2 = inlined_call_operand.vmem [shape: f32[1,64], index: 2, kind: input, shape index: {}]   ;;  %s244_s3 = inlined_call_operand.hbm [shape: f32[16,64], index: 3, kind: output, shape index: {}]  }
   0x1   :  { %9 = vsyncpa [#allocation6], 0 }
   0x2   :  { %10 = vsyncpa [#allocation4], 0  ;;  %s15_s14 = sshll.u32 %s241_s0, 4  ;;  %s196_s15 = smov [#allocation2]   ;;  %s16_s14 = int_to_ptr.hbm [resolvable:$true] %s15_s14 }
   0x3   :  { %s17_s16 = sshll.u32 %s196_s15, 4  ;;  %s28_s19 = sshll.u32 %s242_s1, 4  ;;  %s18_s16 = int_to_ptr.vmem [resolvable:$true] %s17_s16  ;;  %s29_s19 = int_to_ptr.hbm [resolvable:$true] %s28_s19 }
   0x4   :  { %s197_s20 = smov 128   ;;  %s198_s21 = smov 8  }
   0x5   :  { %23 = dma.hbm_to_vmem [thread:$0]  %s16_s14, 256, %s18_s16, [#allocation3], %s197_s20, %s197_s20, %s198_s21  }
   0x6   :  { %s199_s22 = smov [#allocation5]   ;;  %s200_s24 = smov 64  }
   0x7   :  { %s30_s23 = sshll.u32 %s199_s22, 4  ;;  %s201_s0 = smov 4   ;;  %s31_s23 = int_to_ptr.vmem [resolvable:$true] %s30_s23 }
   0x8   :  { %36 = dma.hbm_to_vmem [thread:$0]  %s29_s19, 128, %s31_s23, [#allocation6], %s200_s24, %s200_s24, %s201_s0  }
   0x9   :  { %190 = dma.done.wait [#allocation3], 256  }
   0xa   :  { %191 = vsyncadd [#allocation3], 4294967040 }
   0xb   :  { %192 = dma.done.wait [#allocation6], 128  }
   0xc   :  { %193 = vsyncadd [#allocation6], 4294967168  ;;  %v109_v0 = vld [vmem:[#allocation5] sm:$0xff]  ;;  %v48_v1 = vld [vmem:[#allocation2] sm:$0xff]  ;;  %vm63_vm0 = vcmask 130048   ;;  %vm81_vm1 = vcmask 523264  }
   0xd   :  { %v49_v2 = vld [vmem:[#allocation2 + $0x8] sm:$0xff]  ;;  %74 = vmatpush.bf16.msra.mxu0 %v109_v0  ;;  %v117_v4 = vld [vmem:[%s243_s2] ss:$0 sm:$0xff]  ;;  %s202_s26 = smov [#allocation7]   ;;  %s90_s30 = sshll.u32 %s244_s3, 4  ;;  %s91_s30 = int_to_ptr.hbm [resolvable:$true] %s90_s30 }
   0xe   :  { %v50_v3 = vpack.c.bf16 %v49_v2, %v48_v1  ;;  %s88_s27 = sshll.u32 %s202_s26, 4  ;;  %s89_s27 = int_to_ptr.vmem [resolvable:$true] %s88_s27 }
  0x10   :  { %108 = vmatmul.msk.bf16.vlgmr.msra.gmra.mxu0 %vm63_vm0, %v50_v3 }
  0x8d   :  { %v76_v5 = vpop.f32.mrf.mxu0 }
  0x8e   :  { %v77_v6 = vadd.f32 %v117_v4, %v76_v5 }
  0x90   :  { %82 = vst.msk [vmem:[#allocation7] sm:$0xff] %vm81_vm1, %v77_v6 }
  0x95   :  { %v78_v7 = vpop.f32.mrf.mxu0 }
  0x96   :  { %v79_v8 = vadd.f32 %v117_v4, %v78_v7 }
  0x98   :  { %83 = vst.msk [vmem:[#allocation7 + $0x8] sm:$0xff] %vm81_vm1, %v79_v8 }
  0x99   :  { %96 = dma.vmem_to_hbm [thread:$0]  %s89_s27, 256, %s91_s30, [#allocation4], %s197_s20, %s197_s20, %s198_s21  }
  0x9a   :  { %194 = dma.done.wait [#allocation4], 256  }
  0x9b   :  { %195 = vsyncadd [#allocation4], 4294967040 }
  0x9c   :  { %101 = vsyncpa [#allocation3], 1 }
  0x9d   :  { %102 = vsyncpa [#allocation6], 1 }
  0x9e   :  { %103 = vsyncpa [#allocation4], 1 }

</bundles_post_ra>
